<compile_context>
chip_gen: v7x
topology: tpu7x:2x2x1
jax: 0.10.0
libtpu: 0.0.40
codegen_flags: <defaults>
</compile_context>

<pallas_src>
import functools

import jax
import jax.numpy as jnp
from jax import lax
from jax.experimental import pallas as pl
from jax.experimental.pallas import tpu as pltpu

_LANES = 128
_BLOCK_BYTES = 4 * 1024 * 1024        # ~4 MiB input blocks (double-buffered)


def _per_element_loss(x, *, use_lsgan, target):
    """Per-element loss vs a constant target; x is float32. Pure jnp (usable
    both inside the kernel and for the tiny lane-tail in the wrapper)."""
    if use_lsgan:                                   # MSE
        d = x if target == 0.0 else x - jnp.float32(target)
        return d * d
    # binary_cross_entropy with logs clamped at -100 (PyTorch behaviour);
    # inputs are assumed to be probabilities in (0, 1).
    if target == 1.0:
        return -jnp.maximum(jnp.log(x), -100.0)
    if target == 0.0:
        return -jnp.maximum(jnp.log(1.0 - x), -100.0)
    t = jnp.float32(target)
    return -(t * jnp.maximum(jnp.log(x), -100.0)
             + (1.0 - t) * jnp.maximum(jnp.log(1.0 - x), -100.0))


def _num_tensorcores():
    """2 on v7x-like chips (2 TensorCores), else 1 (v5e/v6e)."""
    try:
        kind = jax.devices()[0].device_kind.lower()
    except Exception:
        return 1
    return 2 if ("v7" in kind or "tpu7" in kind) else 1


def _loss_sum_kernel(x_ref, out_ref, *, valid_rows, block_rows, acc_rows,
                     blocks_per_split, use_lsgan, target, any_ragged):
    """Accumulates sum(per_element_loss(x)) of this split's row-blocks
    directly into the resident (1, acc_rows, 128) output block."""
    c = pl.program_id(0)          # split (TensorCore) index
    j = pl.program_id(1)          # row-block index within the split

    @pl.when(j == 0)
    def _():
        out_ref[...] = jnp.zeros_like(out_ref)

    gb = c * blocks_per_split + j          # logical global block index

    def block_loss():
        x = x_ref[...]
        if use_lsgan:
            if target != 0.0 and jnp.issubdtype(x.dtype, jnp.floating):
                # Subtract in the native dtype (bf16 VALU on v6e/v7x), then
                # upcast for the square + accumulate.
                d = (x - jnp.asarray(target, dtype=x.dtype)).astype(jnp.float32)
            elif target != 0.0:
                d = x.astype(jnp.float32) - jnp.float32(target)
            else:
                d = x.astype(jnp.float32)
            return d * d
        return _per_element_loss(x.astype(jnp.float32),
                                 use_lsgan=False, target=target)

    def accumulate(masked):
        per = block_loss()
        if masked:
            # Cheap mask: (block_rows, 1) row-iota, broadcast by the select.
            # Keep jnp.where (select) so garbage/NaN in the DMA-padded
            # overhang of a partial block is discarded, not multiplied.
            row_ids = (lax.broadcasted_iota(jnp.int32, (block_rows, 1), 0)
                       + gb * block_rows)
            per = jnp.where(row_ids < valid_rows, per, 0.0)
        out_ref[...] += jnp.sum(
            per.reshape(block_rows // acc_rows, acc_rows, _LANES),
            axis=0, keepdims=True)

    if not any_ragged:
        accumulate(False)                   # hot path: no masking compiled
    else:
        in_bounds = (gb + 1) * block_rows <= valid_rows
        pl.when(in_bounds)(lambda: accumulate(False))
        pl.when(jnp.logical_not(in_bounds))(lambda: accumulate(True))


@functools.partial(jax.jit, static_argnames=("target", "use_lsgan"))
def _gan_loss_mean(x, *, target, use_lsgan):
    n = x.size
    if n == 0:
        return jnp.float32(jnp.nan)         # matches torch mean over empty

    flat = x.reshape(-1)                    # free bitcast
    valid_rows = n // _LANES
    tail = n - valid_rows * _LANES

    total = jnp.float32(0.0)
    if tail:
        # <128 leftover elements: reduce with a tiny jnp expression instead of
        # padding (and re-copying) the whole tensor.
        tail_x = flat[valid_rows * _LANES:].astype(jnp.float32)
        total = total + jnp.sum(
            _per_element_loss(tail_x, use_lsgan=use_lsgan, target=target))

    if valid_rows:
        itemsize = jnp.dtype(x.dtype).itemsize
        budget_rows = _BLOCK_BYTES // (_LANES * itemsize)   # multiple of 32
        if valid_rows <= budget_rows:
            block_rows = valid_rows          # single full-dim block, no mask
        else:
            block_rows = budget_rows
        # Accumulator depth: 32 rows (4 f32 vregs) when possible for VALU ILP.
        if block_rows % 32 == 0:
            acc_rows = 32
        elif block_rows % 16 == 0:
            acc_rows = 16
        elif block_rows % 8 == 0:
            acc_rows = 8
        else:
            acc_rows = block_rows            # tiny single-block case

        num_blocks = pl.cdiv(valid_rows, block_rows)
        num_tc = _num_tensorcores()
        num_splits = num_tc if (num_tc > 1 and num_blocks >= num_tc) else 1
        blocks_per_split = pl.cdiv(num_blocks, num_splits)
        covered_rows = num_splits * blocks_per_split * block_rows
        any_ragged = covered_rows > valid_rows

        if num_splits * blocks_per_split == num_blocks:
            x_index_map = lambda c, j: (c * blocks_per_split + j, 0)
        else:
            # Clamp phantom blocks into range; their contribution is masked.
            x_index_map = lambda c, j: (
                jnp.minimum(c * blocks_per_split + j, num_blocks - 1), 0)

        if tail:
            # Lane-aligned prefix only (the tail was reduced above).
            x2d = flat[: valid_rows * _LANES].reshape(valid_rows, _LANES)
        else:
            x2d = flat.reshape(valid_rows, _LANES)   # free bitcast, no copy

        kernel = functools.partial(
            _loss_sum_kernel, valid_rows=valid_rows, block_rows=block_rows,
            acc_rows=acc_rows, blocks_per_split=blocks_per_split,
            use_lsgan=use_lsgan, target=target, any_ragged=any_ragged)

        kn = valid_rows * _LANES
        cost = pl.CostEstimate(
            flops=3 * kn,
            transcendentals=0 if use_lsgan else 2 * kn,
            bytes_accessed=kn * itemsize + num_splits * acc_rows * _LANES * 4)

        if num_splits > 1:
            dim_sems = (pltpu.CORE_PARALLEL, pltpu.ARBITRARY)
        else:
            dim_sems = ("arbitrary", "arbitrary")

        partials = pl.pallas_call(
            kernel,
            out_shape=jax.ShapeDtypeStruct(
                (num_splits, acc_rows, _LANES), jnp.float32),
            grid_spec=pltpu.PrefetchScalarGridSpec(
                num_scalar_prefetch=0,
                grid=(num_splits, blocks_per_split),
                in_specs=[pl.BlockSpec((block_rows, _LANES), x_index_map)],
                out_specs=pl.BlockSpec((1, acc_rows, _LANES),
                                       lambda c, j: (c, 0, 0)),
            ),
            compiler_params=pltpu.CompilerParams(
                dimension_semantics=dim_sems,
                vmem_limit_bytes=32 * 1024 * 1024),
            cost_estimate=cost,
        )(x2d)

        total = total + jnp.sum(partials)

    return total / jnp.float32(n)


def gan_loss(x, target_is_real, use_lsgan=True,
             target_real_label=1.0, target_fake_label=0.0):
    """Equivalent of GANLoss(use_lsgan, ...).forward(input, target_is_real)."""
    target = float(target_real_label if target_is_real else target_fake_label)
    return _gan_loss_mean(x, target=target, use_lsgan=bool(use_lsgan))


if __name__ == "__main__":
    key = jax.random.PRNGKey(0)
    k1, k2, k3, k4 = jax.random.split(key, 4)

    # Small discriminator-style output, NCHW.
    x = jax.random.normal(k1, (2, 4, 16, 16), dtype=jnp.float32)
    loss_real = gan_loss(x, target_is_real=True, use_lsgan=True)
    loss_fake = gan_loss(x, target_is_real=False, use_lsgan=True)
    jax.block_until_ready((loss_real, loss_fake))
    assert jnp.allclose(loss_real, jnp.mean((x - 1.0) ** 2), rtol=1e-5, atol=1e-6)
    assert jnp.allclose(loss_fake, jnp.mean(x ** 2), rtol=1e-5, atol=1e-6)

    # BCE path (use_lsgan=False) — input must be probabilities.
    p = jax.nn.sigmoid(jax.random.normal(k2, (2, 4, 16, 16), dtype=jnp.float32))
    bce_real = gan_loss(p, target_is_real=True, use_lsgan=False)
    bce_fake = gan_loss(p, target_is_real=False, use_lsgan=False)
    jax.block_until_ready((bce_real, bce_fake))
    ref_bce_r = jnp.mean(-(jnp.maximum(jnp.log(p), -100.0)))
    ref_bce_f = jnp.mean(-(jnp.maximum(jnp.log(1.0 - p), -100.0)))
    assert jnp.allclose(bce_real, ref_bce_r, rtol=1e-4, atol=1e-6)
    assert jnp.allclose(bce_fake, ref_bce_f, rtol=1e-4, atol=1e-6)

    # PatchGAN-style shape with a <128-element lane tail (1800 = 14*128 + 8).
    xp = jax.random.normal(k3, (2, 1, 30, 30), dtype=jnp.float32)
    lp = gan_loss(xp, target_is_real=True, use_lsgan=True)
    jax.block_until_ready(lp)
    assert jnp.allclose(lp, jnp.mean((xp - 1.0) ** 2), rtol=1e-5, atol=1e-6)

    # bf16 input, rows not a sublane multiple: single lane-dense block, no pad.
    xb = jax.random.normal(k4, (2, 1, 512, 513), dtype=jnp.bfloat16)
    lb = gan_loss(xb, target_is_real=True, use_lsgan=True)
    jax.block_until_ready(lb)
    assert jnp.allclose(lb, jnp.mean((xb.astype(jnp.float32) - 1.0) ** 2),
                        rtol=2e-3)

    # Multi-block f32 input (>4 MiB): exercises the partial-block row mask,
    # the lane-tail path, and the 2-way core split on multi-TC chips.
    xm = jax.random.normal(jax.random.PRNGKey(1), (5, 3, 331, 331),
                           dtype=jnp.float32)
    lm = gan_loss(xm, target_is_real=False, use_lsgan=True)
    jax.block_until_ready(lm)
    assert jnp.allclose(lm, jnp.mean(xm ** 2), rtol=1e-4)

    print("KERNEL_OK")
</pallas_src>

<mosaic_0001>
module attributes {stable_mosaic.version = 11 : i64} {
  func.func @_loss_sum_kernel(%arg0: i32, %arg1: i32, %arg2: memref<16x128xf32, #tpu.memory_space<vmem>>, %arg3: memref<1x16x128xf32, #tpu.memory_space<vmem>>) attributes {dimension_semantics = [#tpu.dimension_semantics<arbitrary>, #tpu.dimension_semantics<arbitrary>], iteration_bounds = array<i64: 1, 1>, scalar_prefetch = 0 : i64, scratch_operands = 0 : i64, tpu.core_type = #tpu.core_type<tc>, window_params = [{transform_indices = @transform_0, window_bounds = array<i64: 16, 128>}, {transform_indices = @transform_1, window_bounds = array<i64: 1, 16, 128>}]} {
    %c0_i32 = arith.constant 0 : i32
    %0 = arith.cmpi eq, %arg1, %c0_i32 : i32
    %1 = arith.extui %0 : i1 to i32
    %c0_i32_0 = arith.constant 0 : i32
    %2 = arith.cmpi ne, %1, %c0_i32_0 : i32
    scf.if %2 {
      %cst_9 = arith.constant 0.000000e+00 : f32
      %13 = vector.broadcast %cst_9 : f32 to vector<1x16x128xf32>
      %c0_10 = arith.constant 0 : index
      %c0_11 = arith.constant 0 : index
      %c0_12 = arith.constant 0 : index
      %14 = vector.load %arg3[%c0_10, %c0_11, %c0_12] : memref<1x16x128xf32, #tpu.memory_space<vmem>>, vector<1x16x128xf32>
      tpu.vector_store %arg3[%c0_10, %c0_11, %c0_12], %13 {strides = array<i32>} : memref<1x16x128xf32, #tpu.memory_space<vmem>>, vector<1x16x128xf32>,
    } else {
    }
    %c0 = arith.constant 0 : index
    %c0_1 = arith.constant 0 : index
    %3 = vector.load %arg2[%c0, %c0_1] : memref<16x128xf32, #tpu.memory_space<vmem>>, vector<16x128xf32>
    %cst = arith.constant 1.000000e+00 : f32
    %4 = vector.broadcast %cst : f32 to vector<16x128xf32>
    %5 = arith.subf %3, %4 : vector<16x128xf32>
    %6 = arith.mulf %5, %5 : vector<16x128xf32>
    %c0_2 = arith.constant 0 : index
    %c0_3 = arith.constant 0 : index
    %c0_4 = arith.constant 0 : index
    %7 = vector.load %arg3[%c0_2, %c0_3, %c0_4] : memref<1x16x128xf32, #tpu.memory_space<vmem>>, vector<1x16x128xf32>
    %8 = vector.shape_cast %6 : vector<16x128xf32> to vector<1x16x128xf32>
    %cst_5 = arith.constant dense<0.000000e+00> : vector<16x128xf32>
    %9 = vector.multi_reduction <add>, %8, %cst_5 [0] : vector<1x16x128xf32> to vector<16x128xf32>
    %10 = vector.shape_cast %9 : vector<16x128xf32> to vector<1x16x128xf32>
    %11 = arith.addf %7, %10 : vector<1x16x128xf32>
    %c0_6 = arith.constant 0 : index
    %c0_7 = arith.constant 0 : index
    %c0_8 = arith.constant 0 : index
    %12 = vector.load %arg3[%c0_6, %c0_7, %c0_8] : memref<1x16x128xf32, #tpu.memory_space<vmem>>, vector<1x16x128xf32>
    tpu.vector_store %arg3[%c0_6, %c0_7, %c0_8], %11 {strides = array<i32>} : memref<1x16x128xf32, #tpu.memory_space<vmem>>, vector<1x16x128xf32>,
    return
  }
  func.func @transform_0(%arg0: i32, %arg1: i32) -> (i32, i32) {
    %c1_i32 = arith.constant 1 : i32
    %0 = arith.muli %arg0, %c1_i32 : i32
    %1 = arith.addi %0, %arg1 : i32
    %c0_i32 = arith.constant 0 : i32
    %c0_i32_0 = arith.constant 0 : i32
    return %1, %c0_i32 : i32, i32
  }
  func.func @transform_1(%arg0: i32, %arg1: i32) -> (i32, i32, i32) {
    %c0_i32 = arith.constant 0 : i32
    %c0_i32_0 = arith.constant 0 : i32
    %c0_i32_1 = arith.constant 0 : i32
    return %arg0, %c0_i32, %c0_i32_0 : i32, i32, i32
  }
}

</mosaic_0001>

<bundles_post_ra>
// kernel: _gan_loss_mean.1
= control target key start
LH: loop header
LB: loop body
LE: loop exit
PB: predicated region body
PF: predicated region fallthrough
CT: control target
= control target key end

     0   :  { %s85_s0 = inlined_call_operand.vmem [shape: f32[16,128], index: 0, kind: input, shape index: {}]   ;;  %s86_s1 = inlined_call_operand.vmem [shape: f32[1,16,128], index: 1, kind: output, shape index: {}]  }
   0x1   :  { %v36_v0 = vld [vmem:[%s85_s0] sm:$0xff]  ;;  %v37_v1 = vld [vmem:[%s85_s0 + $0x8] sm:$0xff] }
   0x2   :  { %v60_v2 = vadd.f32 -1.0, %v36_v0  ;;  %v61_v3 = vadd.f32 -1.0, %v37_v1 }
   0x4   :  { %v40_v4 = vmul.f32 %v60_v2, %v60_v2  ;;  %v41_v5 = vmul.f32 %v61_v3, %v61_v3 }
   0x6   :  { %48 = vst [vmem:[%s86_s1] sm:$0xff] %v40_v4  ;;  %49 = vst [vmem:[%s86_s1 + $0x8] sm:$0xff] %v41_v5 }

</bundles_post_ra>
